<compile_context>
chip_gen: v7x
topology: tpu7x:2x2x1
jax: 0.10.0
libtpu: 0.0.40
codegen_flags: <defaults>
</compile_context>

<pallas_src>
import functools

import jax
import jax.numpy as jnp
from jax.experimental import pallas as pl
from jax.experimental.pallas import tpu as pltpu


def _chip_config():
    """Return (vmem_limit_bytes, max_block_bytes, min_grid) per TPU generation."""
    kind = ""
    try:
        kind = jax.devices()[0].device_kind.lower()
    except Exception:
        pass
    is_v7 = ("v7" in kind) or ("tpu7" in kind)
    two_tc = is_v7 or ("v4" in kind) or ("v5p" in kind)
    if is_v7:
        # v7x: 64 MiB physical VMEM per TensorCore -> conservative scoped limit.
        vmem_limit = 48 * 1024 * 1024
        max_block = 6 * 1024 * 1024
    else:
        # v5e / v6e: 128 MiB physical VMEM; bigger blocks amortize per-step cost.
        vmem_limit = 64 * 1024 * 1024
        max_block = 8 * 1024 * 1024
    min_grid = 2 if two_tc else 1   # keep both TensorCores busy on 2-TC chips
    return vmem_limit, max_block, min_grid


def _choose_bt(B, per_batch_bytes, max_block_bytes, min_grid):
    """Largest divisor Bt of B with Bt*per_batch <= budget and grid >= min_grid."""
    best = 1
    for bt in range(1, B + 1):
        if B % bt:
            continue
        if bt * per_batch_bytes > max_block_bytes:
            break
        if bt > 1 and (B // bt) < min_grid:
            break
        best = bt
    return best


def _choose_hw_tile(hw_pad, C, itemsize, max_block_bytes):
    """Largest multiple of 128 dividing hw_pad whose (C, tile) slab fits budget."""
    best = 128
    for t in range(128, hw_pad + 1, 128):
        if hw_pad % t == 0 and C * t * itemsize <= max_block_bytes:
            best = t
    return best


def _se_v2_kernel(x_ref, w14_ref, wfc_ref, out_ref, *, inv_hw):
    # x_ref: (Bt, C, HWp) native dtype; w14_ref: (C, 4h); wfc_ref: (4h, C).
    x = x_ref[...]
    # AdaptiveAvgPool2d(1): accumulate in f32 and scale by 1/HW of the TRUE
    # spatial extent (lane zero-padding therefore does not change the result).
    y = jnp.sum(x, axis=-1, dtype=jnp.float32) * inv_hw               # (Bt, C)
    # fc1..fc4 (Linear C -> C//r, bias=False) + ReLU, fused into one matmul
    # over the concatenated transposed weights.  Tiny GEMM; hidden by the DMA.
    h = jnp.maximum(
        jnp.dot(y, w14_ref[...], preferred_element_type=jnp.float32), 0.0)
    # Final Linear(4h -> C, bias=False) + Sigmoid.
    s = jax.nn.sigmoid(
        jnp.dot(h, wfc_ref[...], preferred_element_type=jnp.float32))
    # Per-channel scale broadcast along lanes; multiply in x's native dtype
    # (bf16-native VPU on v6e/v7x), single cast at the store.
    out_ref[...] = (x * s.astype(x.dtype)[:, :, None]).astype(out_ref.dtype)


def _scale_kernel(x_ref, s_ref, out_ref):
    # Fallback scale pass: x_ref (1, C, HWt), s_ref (1, C, 1) f32.
    x = x_ref[...]
    out_ref[...] = (x * s_ref[...].astype(x.dtype)).astype(out_ref.dtype)


@functools.partial(jax.jit, static_argnames=("max_block_override",))
def se_layer_v2(x_nchw, w14, wfc, max_block_override=None):
    """SELayerV2 forward.  x_nchw: (B, C, H, W); w14: (C, 4h); wfc: (4h, C)."""
    B, C, H, W = x_nchw.shape
    HW = H * W
    h4 = w14.shape[1]
    itemsize = jnp.dtype(x_nchw.dtype).itemsize

    vmem_limit, max_block, min_grid = _chip_config()
    if max_block_override is not None:
        max_block = max_block_override

    # Lane-density guard: pad the spatial (lane) axis up to a multiple of 128
    # so output stores stay unmasked.  The NCHW->(B,C,HW) reshape is free.
    hw_pad = -(-HW // 128) * 128
    x = x_nchw.reshape(B, C, HW)
    if hw_pad != HW:
        x = jnp.pad(x, ((0, 0), (0, 0), (0, hw_pad - HW)))

    per_batch_bytes = C * hw_pad * itemsize
    inv_hw = 1.0 / float(HW)

    if per_batch_bytes <= max_block:
        # Fused single pass: x streamed once each way.  Bt whole batch elements
        # per block; the grid is forced >= 2 only on 2-TensorCore chips.
        Bt = _choose_bt(B, per_batch_bytes, max_block, min_grid)
        grid = (B // Bt,)
        cost = pl.CostEstimate(
            flops=3 * B * C * HW + 4 * B * C * h4,
            transcendentals=B * C,
            bytes_accessed=2 * B * C * hw_pad * itemsize + 2 * C * h4 * 4,
        )
        out = pl.pallas_call(
            functools.partial(_se_v2_kernel, inv_hw=inv_hw),
            out_shape=jax.ShapeDtypeStruct((B, C, hw_pad), x_nchw.dtype),
            grid_spec=pltpu.PrefetchScalarGridSpec(
                num_scalar_prefetch=0,
                grid=grid,
                in_specs=[
                    # Full (C, HWp) slabs: last two block dims equal the array
                    # extents and HWp is a multiple of 128 -> lane-dense stores.
                    pl.BlockSpec((Bt, C, hw_pad), lambda b: (b, 0, 0)),
                    # Weights: constant block index -> fetched once, VMEM resident.
                    pl.BlockSpec((C, h4), lambda b: (0, 0)),
                    pl.BlockSpec((h4, C), lambda b: (0, 0)),
                ],
                out_specs=pl.BlockSpec((Bt, C, hw_pad), lambda b: (b, 0, 0)),
            ),
            compiler_params=pltpu.CompilerParams(
                dimension_semantics=("parallel",),
                vmem_limit_bytes=vmem_limit,
            ),
            cost_estimate=cost,
        )(x, w14, wfc)
    else:
        # Fallback for slabs too large for one VMEM block (e.g. big C*HW on
        # v7x): pool + excite MLP in plain XLA (one read of x), then a
        # lane-tiled Pallas scale pass (one read + one write of x).
        y = jnp.mean(x_nchw, axis=(2, 3), dtype=jnp.float32)          # (B, C)
        hmid = jnp.maximum(y @ w14.astype(jnp.float32), 0.0)          # (B, 4h)
        s = jax.nn.sigmoid(hmid @ wfc.astype(jnp.float32))            # (B, C)
        s3 = s[:, :, None]                                            # (B, C, 1)
        hwt = _choose_hw_tile(hw_pad, C, itemsize, max_block)
        grid = (B, hw_pad // hwt)
        out = pl.pallas_call(
            _scale_kernel,
            out_shape=jax.ShapeDtypeStruct((B, C, hw_pad), x_nchw.dtype),
            grid_spec=pltpu.PrefetchScalarGridSpec(
                num_scalar_prefetch=0,
                grid=grid,
                in_specs=[
                    pl.BlockSpec((1, C, hwt), lambda b, t: (b, 0, t)),
                    pl.BlockSpec((1, C, 1), lambda b, t: (b, 0, 0)),
                ],
                out_specs=pl.BlockSpec((1, C, hwt), lambda b, t: (b, 0, t)),
            ),
            compiler_params=pltpu.CompilerParams(
                dimension_semantics=("parallel", "parallel"),
                vmem_limit_bytes=vmem_limit,
            ),
        )(x, s3)

    if hw_pad != HW:
        out = out[:, :, :HW]
    return out.reshape(B, C, H, W)


def _reference(x_nchw, w14, wfc):
    # Plain-JAX reference of the PyTorch forward, for correctness checks.
    y = jnp.mean(x_nchw.astype(jnp.float32), axis=(2, 3))       # (B, C)
    h = jnp.maximum(y @ w14, 0.0)                               # (B, 4h)
    s = jax.nn.sigmoid(h @ wfc)                                 # (B, C)
    return x_nchw * s.astype(x_nchw.dtype)[:, :, None, None]


if __name__ == "__main__":
    # SELayerV2 constraints: in_channel >= reduction(=32) and divisible by it.
    B, C, H, W = 2, 64, 16, 16
    reduction, cardinality = 32, 4
    hidden = C // reduction                       # 2
    h4 = hidden * cardinality                     # 8

    key = jax.random.PRNGKey(0)
    kx, k1, k2, k3, k4, k5 = jax.random.split(key, 6)

    x = jax.random.normal(kx, (B, C, H, W), dtype=jnp.float32)

    # PyTorch Linear weights are (out, in); the kernel consumes the transposed
    # (in, out) versions, with fc1..fc4 concatenated along the output axis.
    scale = 0.1
    w1t = scale * jax.random.normal(k1, (C, hidden), dtype=jnp.float32)
    w2t = scale * jax.random.normal(k2, (C, hidden), dtype=jnp.float32)
    w3t = scale * jax.random.normal(k3, (C, hidden), dtype=jnp.float32)
    w4t = scale * jax.random.normal(k4, (C, hidden), dtype=jnp.float32)
    w14 = jnp.concatenate([w1t, w2t, w3t, w4t], axis=1)               # (C, 4h)
    wfc = scale * jax.random.normal(k5, (h4, C), dtype=jnp.float32)   # (4h, C)

    ref = _reference(x, w14, wfc)

    # Fused single-pass path (the normal case).
    out = jax.block_until_ready(se_layer_v2(x, w14, wfc))
    assert out.shape == (B, C, H, W)
    assert jnp.allclose(out, ref, atol=1e-5, rtol=1e-5)

    # Exercise the large-slab fallback (XLA pool/excite + lane-tiled Pallas
    # scale) by shrinking the per-block budget below one (C, HW) slab.
    out_fb = jax.block_until_ready(
        se_layer_v2(x, w14, wfc, max_block_override=32 * 1024))
    assert jnp.allclose(out_fb, ref, atol=1e-5, rtol=1e-5)

    print("KERNEL_OK")
</pallas_src>

<mosaic_0001>
module attributes {stable_mosaic.version = 11 : i64} {
  func.func @_se_v2_kernel(%arg0: i32, %arg1: memref<2x64x256xf32, #tpu.memory_space<vmem>>, %arg2: memref<64x8xf32, #tpu.memory_space<vmem>>, %arg3: memref<8x64xf32, #tpu.memory_space<vmem>>, %arg4: memref<2x64x256xf32, #tpu.memory_space<vmem>>) attributes {dimension_semantics = [#tpu.dimension_semantics<parallel>], iteration_bounds = array<i64: 1>, scalar_prefetch = 0 : i64, scratch_operands = 0 : i64, tpu.core_type = #tpu.core_type<tc>, window_params = [{transform_indices = @transform_0, window_bounds = array<i64: 2, 64, 256>}, {pipeline_mode = #tpu.pipeline_mode<synchronous>, transform_indices = @transform_1, window_bounds = array<i64: 64, 8>}, {pipeline_mode = #tpu.pipeline_mode<synchronous>, transform_indices = @transform_2, window_bounds = array<i64: 8, 64>}, {transform_indices = @transform_3, window_bounds = array<i64: 2, 64, 256>}]} {
    %c0 = arith.constant 0 : index
    %c0_0 = arith.constant 0 : index
    %c0_1 = arith.constant 0 : index
    %0 = vector.load %arg1[%c0, %c0_0, %c0_1] : memref<2x64x256xf32, #tpu.memory_space<vmem>>, vector<2x64x256xf32>
    %cst = arith.constant dense<0.000000e+00> : vector<2x64xf32>
    %1 = vector.multi_reduction <add>, %0, %cst [2] : vector<2x64x256xf32> to vector<2x64xf32>
    %cst_2 = arith.constant 3.906250e-03 : f32
    %2 = vector.broadcast %cst_2 : f32 to vector<2x64xf32>
    %3 = arith.mulf %1, %2 : vector<2x64xf32>
    %c0_3 = arith.constant 0 : index
    %c0_4 = arith.constant 0 : index
    %4 = vector.load %arg2[%c0_3, %c0_4] : memref<64x8xf32, #tpu.memory_space<vmem>>, vector<64x8xf32>
    %cst_5 = arith.constant dense<0.000000e+00> : vector<2x8xf32>
    %5 = tpu.matmul %3, %4, %cst_5 {dimension_numbers = #tpu.dot_dimension_numbers<[1], [0], [0], [1], [0, 0, 1, 1], [], []>} : vector<2x64xf32>, vector<64x8xf32>, vector<2x8xf32> -> vector<2x8xf32>
    %cst_6 = arith.constant 0.000000e+00 : f32
    %6 = vector.broadcast %cst_6 : f32 to vector<2x8xf32>
    %7 = arith.maximumf %5, %6 : vector<2x8xf32>
    %c0_7 = arith.constant 0 : index
    %c0_8 = arith.constant 0 : index
    %8 = vector.load %arg3[%c0_7, %c0_8] : memref<8x64xf32, #tpu.memory_space<vmem>>, vector<8x64xf32>
    %cst_9 = arith.constant dense<0.000000e+00> : vector<2x64xf32>
    %9 = tpu.matmul %7, %8, %cst_9 {dimension_numbers = #tpu.dot_dimension_numbers<[1], [0], [0], [1], [0, 0, 1, 1], [], []>} : vector<2x8xf32>, vector<8x64xf32>, vector<2x64xf32> -> vector<2x64xf32>
    %10 = arith.negf %9 : vector<2x64xf32>
    %11 = math.exp %10 : vector<2x64xf32>
    %cst_10 = arith.constant 1.000000e+00 : f32
    %12 = vector.broadcast %cst_10 : f32 to vector<2x64xf32>
    %13 = arith.addf %12, %11 : vector<2x64xf32>
    %14 = arith.divf %12, %13 : vector<2x64xf32>
    %15 = vector.shape_cast %14 : vector<2x64xf32> to vector<2x64x1xf32>
    %16 = vector.broadcast %15 : vector<2x64x1xf32> to vector<2x64x256xf32>
    %17 = arith.mulf %0, %16 : vector<2x64x256xf32>
    %c0_11 = arith.constant 0 : index
    %c0_12 = arith.constant 0 : index
    %c0_13 = arith.constant 0 : index
    %18 = vector.load %arg4[%c0_11, %c0_12, %c0_13] : memref<2x64x256xf32, #tpu.memory_space<vmem>>, vector<2x64x256xf32>
    tpu.vector_store %arg4[%c0_11, %c0_12, %c0_13], %17 {strides = array<i32>} : memref<2x64x256xf32, #tpu.memory_space<vmem>>, vector<2x64x256xf32>,
    return
  }
  func.func @transform_0(%arg0: i32) -> (i32, i32, i32) {
    %c0_i32 = arith.constant 0 : i32
    %c0_i32_0 = arith.constant 0 : i32
    %c0_i32_1 = arith.constant 0 : i32
    return %arg0, %c0_i32, %c0_i32_0 : i32, i32, i32
  }
  func.func @transform_1(%arg0: i32) -> (i32, i32) {
    %c0_i32 = arith.constant 0 : i32
    %c0_i32_0 = arith.constant 0 : i32
    %c0_i32_1 = arith.constant 0 : i32
    return %c0_i32, %c0_i32_0 : i32, i32
  }
  func.func @transform_2(%arg0: i32) -> (i32, i32) {
    %c0_i32 = arith.constant 0 : i32
    %c0_i32_0 = arith.constant 0 : i32
    %c0_i32_1 = arith.constant 0 : i32
    return %c0_i32, %c0_i32_0 : i32, i32
  }
  func.func @transform_3(%arg0: i32) -> (i32, i32, i32) {
    %c0_i32 = arith.constant 0 : i32
    %c0_i32_0 = arith.constant 0 : i32
    %c0_i32_1 = arith.constant 0 : i32
    return %arg0, %c0_i32, %c0_i32_0 : i32, i32, i32
  }
}

</mosaic_0001>

<bundles_post_ra>
// kernel: se_layer_v2.1
= control target key start
LH: loop header
LB: loop body
LE: loop exit
PB: predicated region body
PF: predicated region fallthrough
CT: control target
= control target key end

     0   :  { %8 = vsyncpa [#allocation3], 0  ;;  %s973_s0 = inlined_call_operand.hbm [shape: f32[2,64,256], index: 0, kind: input, shape index: {}]   ;;  %s974_s1 = inlined_call_operand.hbm [shape: f32[64,8], index: 1, kind: input, shape index: {}]   ;;  %s975_s2 = inlined_call_operand.hbm [shape: f32[8,64], index: 2, kind: input, shape index: {}]   ;;  %s976_s3 = inlined_call_operand.hbm [shape: f32[2,64,256], index: 3, kind: output, shape index: {}]  }
   0x1   :  { %9 = vsyncpa [#allocation6], 0 }
   0x2   :  { %10 = vsyncpa [#allocation4], 0  ;;  %s736_s12 = smov [#allocation5]   ;;  %s642_s16 = scalar_lea.hbm %s974_s1, 1024 }
   0x3   :  { %s28_s13 = sshll.u32 %s736_s12, 4  ;;  %p643_p0 = scmp.ne.s32.totalorder %s974_s1, %s642_s16  ;;  %s29_s13 = int_to_ptr.vmem [resolvable:$true] %s28_s13 }
   0x4   :  { %p646_p1 = scmp.lt.u32.totalorder %s642_s16, %s974_s1 }
   0x6   :  { %p648_p2 = pnand %p646_p1, %p643_p0 }
   0x8   :  { %651 = shalt.err (!%p648_p2)
}
   0x9   :  { %s652_s21 = scalar_lea.vmem %s29_s13, 1024  ;;  %p657_p4 = scmp.lt.s32.totalorder %s29_s13, %s29_s13 }
   0xa   :  { %p653_p3 = scmp.ne.s32.totalorder %s29_s13, %s652_s21  ;;  %p658_p5 = scmp.lt.s32.totalorder %s652_s21, %s652_s21 }
   0xc   :  { %p659_p6 = por %p658_p5, %p657_p4 }
   0xe   :  { %p660_p7 = pnand %p659_p6, %p653_p3 }
  0x10   :  { %663 = shalt.err (!%p660_p7)
}
  0x11   :  { %s737_s22 = smov 128   ;;  %s738_s23 = smov 8  }
  0x12   :  { %34 = dma.hbm_to_vmem [thread:$0]  %s974_s1, 1024, %s29_s13, [#allocation6], %s737_s22, %s737_s22, %s738_s23  }
  0x13   :  { %s739_s26 = smov [#allocation2]   ;;  %s664_s30 = scalar_lea.hbm %s973_s0, 4096 }
  0x14   :  { %s16_s27 = sshll.u32 %s739_s26, 4  ;;  %p665_p8 = scmp.ne.s32.totalorder %s973_s0, %s664_s30  ;;  %s17_s27 = int_to_ptr.vmem [resolvable:$true] %s16_s27 }
  0x15   :  { %p668_p9 = scmp.lt.u32.totalorder %s664_s30, %s973_s0 }
  0x17   :  { %p670_p10 = pnand %p668_p9, %p665_p8 }
  0x19   :  { %673 = shalt.err (!%p670_p10)
}
  0x1a   :  { %s674_s8 = scalar_lea.vmem %s17_s27, 4096  ;;  %p679_p12 = scmp.lt.s32.totalorder %s17_s27, %s17_s27 }
  0x1b   :  { %p675_p11 = scmp.ne.s32.totalorder %s17_s27, %s674_s8  ;;  %p680_p13 = scmp.lt.s32.totalorder %s674_s8, %s674_s8 }
  0x1d   :  { %p681_p0 = por %p680_p13, %p679_p12 }
  0x1f   :  { %p682_p1 = pnand %p681_p0, %p675_p11 }
  0x21   :  { %685 = shalt.err (!%p682_p1)
}
  0x22   :  { %s740_s1 = smov 256   ;;  %s741_s9 = smov 16  }
  0x23   :  { %22 = dma.hbm_to_vmem [thread:$0]  %s973_s0, 4096, %s17_s27, [#allocation3], %s740_s1, %s740_s1, %s741_s9  }
  0x24   :  { %s742_s12 = smov [#allocation7]   ;;  %s686_s16 = scalar_lea.hbm %s975_s2, 128 }
  0x25   :  { %s41_s13 = sshll.u32 %s742_s12, 4  ;;  %p687_p2 = scmp.ne.s32.totalorder %s975_s2, %s686_s16  ;;  %s42_s13 = int_to_ptr.vmem [resolvable:$true] %s41_s13 }
  0x26   :  { %p690_p3 = scmp.lt.u32.totalorder %s686_s16, %s975_s2 }
  0x28   :  { %p692_p4 = pnand %p690_p3, %p687_p2 }
  0x2a   :  { %695 = shalt.err (!%p692_p4)
}
  0x2b   :  { %s696_s21 = scalar_lea.vmem %s42_s13, 128  ;;  %p701_p6 = scmp.lt.s32.totalorder %s42_s13, %s42_s13 }
  0x2c   :  { %p697_p5 = scmp.ne.s32.totalorder %s42_s13, %s696_s21  ;;  %p702_p7 = scmp.lt.s32.totalorder %s696_s21, %s696_s21 }
  0x2e   :  { %p703_p8 = por %p702_p7, %p701_p6 }
  0x30   :  { %p704_p9 = pnand %p703_p8, %p697_p5 }
  0x32   :  { %707 = shalt.err (!%p704_p9)
}
  0x33   :  { %44 = dma.hbm_to_vmem [thread:$0]  %s975_s2, 128, %s42_s13, [#allocation6]  }
  0x34   :  { %730 = dma.done.wait [#allocation3], 4096  }
  0x35   :  { %731 = vsyncadd [#allocation3], 4294963200 }
  0x36   :  { %732 = dma.done.wait [#allocation6], 1152  }
  0x37   :  { %733 = vsyncadd [#allocation6], 4294966144  ;;  %v806_v0 = vld [vmem:[#allocation2 + $0x80] sm:$0xff]  ;;  %v808_v1 = vld [vmem:[#allocation2 + $0x88] sm:$0xff]  ;;  %v743_v51 = vmov 0.0|0.0   ;;  %vm744_vm0 = vmmov 0  }
  0x38   :  { %v810_v2 = vld [vmem:[#allocation2] sm:$0xff]  ;;  %v110_v3 = vadd.f32 %v808_v1, %v806_v0  ;;  %v814_v4 = vld [vmem:[#allocation2 + $0x8] sm:$0xff]  ;;  %v816_v5 = vld [vmem:[#allocation2 + $0x90] sm:$0xff]  ;;  %615 = vmatprep.subr.bf16.mxu0 %v743_v51  ;;  %v745_v61 = vmov 0.0   ;;  %vm185_vm1 = vcmask 130112   ;;  %vm192_vm2 = vcmask 195712  }
  0x39   :  { %v818_v6 = vld [vmem:[#allocation2 + $0x98] sm:$0xff]  ;;  %v86_v7 = vadd.f32 %v814_v4, %v810_v2  ;;  %v822_v8 = vld [vmem:[#allocation2 + $0x10] sm:$0xff]  ;;  %v830_v12 = vld [vmem:[#allocation2 + $0xa0] sm:$0xff]  ;;  %607 = vmatprep.mubr.msk.f32.mxu0 %vm744_vm0, %v745_v61  ;;  %610 = vmatprep.subr.mxu1 %v745_v61  ;;  %vm199_vm3 = vcmask 261312   ;;  %vm206_vm4 = vcmask 326912   ;;  %vm213_vm5 = vcmask 392512  }
  0x3a   :  { %v824_v9 = vld [vmem:[#allocation2 + $0x18] sm:$0xff]  ;;  %111 = vadd.xlane.f32.xlu1 %v110_v3  ;;  %v113_v10 = vadd.f32 %v818_v6, %v816_v5  ;;  %v832_v13 = vld [vmem:[#allocation2 + $0xa8] sm:$0xff]  ;;  %v834_v14 = vld [vmem:[#allocation2 + $0x20] sm:$0xff]  ;;  %612 = vmatprep.mubr.msk.f32.mxu1 %vm744_vm0, %v745_v61  ;;  %vm220_vm6 = vcmask 458112   ;;  %vm227_vm7 = vcmask 523712   ;;  %vm268_vm8 = vcmask 1041409  }
  0x3b   :  { %87 = vadd.xlane.f32.xlu0 %v86_v7  ;;  %v89_v11 = vadd.f32 %v824_v9, %v822_v8  ;;  %v836_v15 = vld [vmem:[#allocation2 + $0x28] sm:$0xff]  ;;  %v116_v16 = vadd.f32 %v832_v13, %v830_v12  ;;  %v842_v18 = vld [vmem:[#allocation2 + $0xb0] sm:$0xff]  ;;  %v844_v19 = vld [vmem:[#allocation2 + $0xb8] sm:$0xff]  ;;  %vm270_vm9 = vcmask 523264   ;;  %vm345_vm10 = vcmask 64512   ;;  %s746_s2 = smov [#allocation8]  }
  0x3c   :  { %v92_v17 = vadd.f32 %v836_v15, %v834_v14  ;;  %984 = vst [vmem:[#allocation12_spill] sm:$0xff] %v844_v19  ;;  %v846_v20 = vld [vmem:[#allocation2 + $0x30] sm:$0xff]  ;;  %v848_v21 = vld [vmem:[#allocation2 + $0x38] sm:$0xff]  ;;  %v119_v22 = vadd.f32 %v844_v19, %v842_v18  ;;  %v854_v24 = vld [vmem:[#allocation2 + $0xc0] sm:$0xff]  ;;  %s564_s23 = sshll.u32 %s746_s2, 4  ;;  %s565_s23 = int_to_ptr.vmem [resolvable:$true] %s564_s23 }
  0x3d   :  { %v95_v23 = vadd.f32 %v848_v21, %v846_v20  ;;  %v856_v25 = vld [vmem:[#allocation2 + $0xc8] sm:$0xff]  ;;  %v858_v26 = vld [vmem:[#allocation2 + $0x40] sm:$0xff]  ;;  %v866_v30 = vld [vmem:[#allocation2 + $0xd0] sm:$0xff]  ;;  %s708_s24 = scalar_lea.vmem %s565_s23, 4096  ;;  %p713_p11 = scmp.lt.s32.totalorder %s565_s23, %s565_s23 }
  0x3e   :  { %114 = vadd.xlane.f32.xlu1 %v113_v10  ;;  %v860_v27 = vld [vmem:[#allocation2 + $0x48] sm:$0xff]  ;;  %v122_v28 = vadd.f32 %v856_v25, %v854_v24  ;;  %985 = vst [vmem:[#allocation13_spill] sm:$0xff] %v866_v30  ;;  %v868_v31 = vld [vmem:[#allocation2 + $0xd8] sm:$0xff]  ;;  %v870_v32 = vld [vmem:[#allocation2 + $0x50] sm:$0xff]  ;;  %v174_v10 = vlaneseq  ;;  %p709_p10 = scmp.ne.s32.totalorder %s565_s23, %s708_s24  ;;  %p714_p12 = scmp.lt.s32.totalorder %s708_s24, %s708_s24 }
  0x3f   :  { %90 = vadd.xlane.f32.xlu0 %v89_v11  ;;  %v98_v29 = vadd.f32 %v860_v27, %v858_v26  ;;  %986 = vst [vmem:[#allocation14_spill] sm:$0xff] %v868_v31  ;;  %v872_v33 = vld [vmem:[#allocation2 + $0x58] sm:$0xff]  ;;  %v125_v34 = vadd.f32 %v868_v31, %v866_v30  ;;  %v878_v36 = vld [vmem:[#allocation2 + $0xe0] sm:$0xff]  ;;  %v880_v37 = vld [vmem:[#allocation2 + $0xe8] sm:$0xff] }
  0x40   :  { %v101_v35 = vadd.f32 %v872_v33, %v870_v32  ;;  %987 = vst [vmem:[#allocation15_spill] sm:$0xff] %v878_v36  ;;  %988 = vst [vmem:[#allocation16_spill] sm:$0xff] %v880_v37  ;;  %v882_v38 = vld [vmem:[#allocation2 + $0x60] sm:$0xff]  ;;  %v884_v39 = vld [vmem:[#allocation2 + $0x68] sm:$0xff]  ;;  %v128_v40 = vadd.f32 %v880_v37, %v878_v36  ;;  %p715_p13 = por %p714_p12, %p713_p11 }
  0x41   :  { %v104_v41 = vadd.f32 %v884_v39, %v882_v38  ;;  %v890_v42 = vld [vmem:[#allocation2 + $0xf0] sm:$0xff]  ;;  %v892_v43 = vld [vmem:[#allocation2 + $0xf8] sm:$0xff]  ;;  %v150_v48 = vld [vmem:[#allocation5] sm:$0xff] }
  0x42   :  { %117 = vadd.xlane.f32.xlu1 %v116_v16  ;;  %989 = vst [vmem:[#allocation17_spill] sm:$0xff] %v890_v42  ;;  %990 = vst [vmem:[#allocation18_spill] sm:$0xff] %v892_v43  ;;  %v894_v44 = vld [vmem:[#allocation2 + $0x70] sm:$0xff]  ;;  %v896_v45 = vld [vmem:[#allocation2 + $0x78] sm:$0xff]  ;;  %v131_v46 = vadd.f32 %v892_v43, %v890_v42  ;;  %p716_p0 = pnand %p715_p13, %p709_p10 }
  0x43   :  { %93 = vadd.xlane.f32.xlu0 %v92_v17  ;;  %v107_v47 = vadd.f32 %v896_v45, %v894_v44  ;;  %v151_v49 = vld [vmem:[#allocation5 + $0x8] sm:$0xff]  ;;  %v152_v52 = vld [vmem:[#allocation5 + $0x10] sm:$0xff]  ;;  %v153_v53 = vld [vmem:[#allocation5 + $0x18] sm:$0xff]  ;;  %v175_v17 = vand.u32 127, %v174_v10 }
  0x44   :  { %v616_v50 = vpack.c.bf16 %v151_v49, %v150_v48  ;;  %v619_v54 = vpack.c.bf16 %v153_v53, %v152_v52  ;;  %v154_v55 = vld [vmem:[#allocation5 + $0x20] sm:$0xff]  ;;  %v155_v56 = vld [vmem:[#allocation5 + $0x28] sm:$0xff]  ;;  %v156_v58 = vld [vmem:[#allocation5 + $0x30] sm:$0xff] }
  0x45   :  { %v622_v57 = vpack.c.bf16 %v155_v56, %v154_v55  ;;  %v157_v59 = vld [vmem:[#allocation5 + $0x38] sm:$0xff] }
  0x46   :  { %120 = vadd.xlane.f32.xlu1 %v119_v22  ;;  %617 = vmatpush3.bf16.msra.mxu0 %v616_v50  ;;  %v625_v60 = vpack.c.bf16 %v157_v59, %v156_v58 }
  0x47   :  { %96 = vadd.xlane.f32.xlu0 %v95_v23  ;;  %618 = vmatprep.subr.bf16.mxu0 %v743_v51  ;;  %v902_v23 = vshrl.u32 %v174_v10, 7 }
  0x4a   :  { %123 = vadd.xlane.f32.xlu1 %v122_v28  ;;  %620 = vmatpush3.bf16.msra.mxu0 %v619_v54 }
  0x4b   :  { %99 = vadd.xlane.f32.xlu0 %v98_v29  ;;  %621 = vmatprep.subr.bf16.mxu0 %v743_v51  ;;  %v180_v29 = vadd.s32 4294967288, %v175_v17 }
  0x4d   :  { %v183_v49 = vsub.s32 %v180_v29, %v902_v23 }
  0x4e   :  { %126 = vadd.xlane.f32.xlu1 %v125_v34  ;;  %623 = vmatpush3.bf16.msra.mxu0 %v622_v57  ;;  %v187_v34 = vadd.s32 4294967280, %v175_v17 }
  0x4f   :  { %102 = vadd.xlane.f32.xlu0 %v101_v35  ;;  %624 = vmatprep.subr.bf16.mxu0 %v743_v51  ;;  %v194_v35 = vadd.s32 4294967272, %v175_v17  ;;  %v215_v51 = vadd.s32 4294967248, %v175_v17 }
  0x50   :  { %v190_v50 = vsub.s32 %v187_v34, %v902_v23 }
  0x51   :  { %v197_v53 = vsub.s32 %v194_v35, %v902_v23 }
  0x52   :  { %129 = vadd.xlane.f32.xlu1 %v128_v40  ;;  %626 = vmatpush3.bf16.msra.mxu0 %v625_v60  ;;  %v201_v40 = vadd.s32 4294967264, %v175_v17 }
  0x53   :  { %105 = vadd.xlane.f32.xlu0 %v104_v41 }
  0x54   :  { %v204_v54 = vsub.s32 %v201_v40, %v902_v23  ;;  %v222_v40 = vadd.s32 4294967240, %v175_v17 }
  0x56   :  { %132 = vadd.xlane.f32.xlu1 %v131_v46  ;;  %v208_v46 = vadd.s32 4294967256, %v175_v17 }
  0x57   :  { %108 = vadd.xlane.f32.xlu0 %v107_v47  ;;  %v178_v47 = vsub.s32 %v175_v17, %v902_v23  ;;  %v225_v17 = vsub.s32 %v222_v40, %v902_v23 }
  0x58   :  { %v211_v57 = vsub.s32 %v208_v46, %v902_v23 }
  0xc7   :  { %v112_v62 = vpop.xlane.xlu1 %111 }
  0xc8   :  { %v88_v63 = vpop.xlane.xlu0 %87  ;;  %v142_v59 = vmul.f32 0.00390625, %v112_v62 }
  0xc9   :  { %v134_v29 = vmul.f32 0.00390625, %v88_v63 }
  0xca   :  { %v232_v37 = vrot.slane %v142_v59, %v178_v47 }
  0xcb   :  { %v115_v3 = vpop.xlane.xlu1 %114  ;;  %v179_v19 = vrot.slane %v134_v29, %v178_v47 }
  0xcc   :  { %v91_v7 = vpop.xlane.xlu0 %90  ;;  %v143_v52 = vmul.f32 0.00390625, %v115_v3  ;;  %v218_v3 = vsub.s32 %v215_v51, %v902_v23 }
  0xcd   :  { %v135_v55 = vmul.f32 0.00390625, %v91_v7 }
  0xce   :  { %v236_v35 = vrot.slane %v143_v52, %v183_v49 }
  0xcf   :  { %v118_v11 = vpop.xlane.xlu1 %117  ;;  %v184_v7 = vrot.slane %v135_v55, %v183_v49 }
  0xd0   :  { %v94_v16 = vpop.xlane.xlu0 %93  ;;  %v144_v56 = vmul.f32 0.00390625, %v118_v11  ;;  %v237_v51 = vsel %vm185_vm1, %v236_v35, %v232_v37  ;;  %v344_v35 = vld [vmem:[#allocation7] sm:$0xff] }
  0xd1   :  { %v136_v60 = vmul.f32 0.00390625, %v94_v16  ;;  %v186_v49 = vsel %vm185_vm1, %v184_v7, %v179_v19  ;;  %611 = vmatpush3.msra.mxu1 %v344_v35 }
  0xd2   :  { %v241_v11 = vrot.slane %v144_v56, %v190_v50 }
  0xd3   :  { %v121_v22 = vpop.xlane.xlu1 %120  ;;  %v191_v62 = vrot.slane %v136_v60, %v190_v50 }
  0xd4   :  { %v97_v28 = vpop.xlane.xlu0 %96  ;;  %v145_v61 = vmul.f32 0.00390625, %v121_v22  ;;  %v242_v55 = vsel %vm192_vm2, %v241_v11, %v237_v51 }
  0xd5   :  { %v137_v34 = vmul.f32 0.00390625, %v97_v28  ;;  %v193_v59 = vsel %vm192_vm2, %v191_v62, %v186_v49 }
  0xd6   :  { %v246_v16 = vrot.slane %v145_v61, %v197_v53 }
  0xd7   :  { %v124_v41 = vpop.xlane.xlu1 %123  ;;  %v198_v63 = vrot.slane %v137_v34, %v197_v53 }
  0xd8   :  { %v100_v48 = vpop.xlane.xlu0 %99  ;;  %v146_v43 = vmul.f32 0.00390625, %v124_v41  ;;  %v247_v47 = vsel %vm199_vm3, %v246_v16, %v242_v55 }
  0xd9   :  { %v138_v42 = vmul.f32 0.00390625, %v100_v48  ;;  %v200_v37 = vsel %vm199_vm3, %v198_v63, %v193_v59 }
  0xda   :  { %v251_v28 = vrot.slane %v146_v43, %v204_v54 }
  0xdb   :  { %v127_v58 = vpop.xlane.xlu1 %126  ;;  %v205_v52 = vrot.slane %v138_v42, %v204_v54 }
  0xdc   :  { %v103_v10 = vpop.xlane.xlu0 %102  ;;  %v147_v31 = vmul.f32 0.00390625, %v127_v58 }
  0xdd   :  { %v139_v30 = vmul.f32 0.00390625, %v103_v10  ;;  %v207_v19 = vsel %vm206_vm4, %v205_v52, %v200_v37  ;;  %v462_v52 = vsub.s32 1, %v902_v23 }
  0xde   :  { %v256_v48 = vrot.slane %v147_v31, %v211_v57  ;;  %v252_v31 = vsel %vm206_vm4, %v251_v28, %v247_v47  ;;  %v427_v28 = vsub.s32 0, %v902_v23 }
  0xdf   :  { %v130_v46 = vpop.xlane.xlu1 %129  ;;  %v212_v56 = vrot.slane %v139_v30, %v211_v57 }
  0xe0   :  { %v148_v22 = vmul.f32 0.00390625, %v130_v46  ;;  %v106_v36 = vpop.xlane.xlu0 %105  ;;  %v257_v54 = vsel %vm213_vm5, %v256_v48, %v252_v31 }
  0xe1   :  { %v140_v41 = vmul.f32 0.00390625, %v106_v36  ;;  %v214_v57 = vsel %vm213_vm5, %v212_v56, %v207_v19 }
  0xe2   :  { %v261_v58 = vrot.slane %v148_v22, %v218_v3 }
  0xe3   :  { %v133_v50 = vpop.xlane.xlu1 %132  ;;  %v219_v53 = vrot.slane %v140_v41, %v218_v3 }
  0xe4   :  { %v149_v43 = vmul.f32 0.00390625, %v133_v50  ;;  %v109_v36 = vpop.xlane.xlu0 %108  ;;  %v262_v60 = vsel %vm220_vm6, %v261_v58, %v257_v54 }
  0xe5   :  { %v141_v42 = vmul.f32 0.00390625, %v109_v36  ;;  %v221_v10 = vsel %vm220_vm6, %v219_v53, %v214_v57 }
  0xe6   :  { %v266_v30 = vrot.slane %v149_v43, %v225_v17 }
  0xe7   :  { %v226_v61 = vrot.slane %v141_v42, %v225_v17 }
  0xe8   :  { %v267_v29 = vsel %vm227_vm7, %v266_v30, %v262_v60  ;;  %v991_v60 = vld [vmem:[#allocation12_spill] sm:$0xff] }
  0xe9   :  { %v228_v34 = vsel %vm227_vm7, %v226_v61, %v221_v10  ;;  %v992_v10 = vld [vmem:[#allocation15_spill] sm:$0xff] }
  0xea   :  { %v269_v3 = vsel %vm268_vm8, %v267_v29, %v228_v34  ;;  %v993_v34 = vld [vmem:[#allocation16_spill] sm:$0xff] }
  0xeb   :  { %608 = vmatmul.mubr.msk.f32.vlgmr.msra.gmra.mrb[0].mxu0 %vm270_vm9, %v269_v3  ;;  %v995_v3 = vld [vmem:[#allocation14_spill] sm:$0xff] }
 0x1be   :  { %v339_v40 = vpop.f32.mrb[0].mxu0 }
 0x1bf   :  { %v343_v7 = vmax.f32 %v339_v40, 0.0  ;;  %v609_v11 = vpop.f32.mrb[1].mxu0  ;;  %v996_v40 = vld [vmem:[#allocation17_spill] sm:$0xff] }
 0x1c0   :  { %v997_v11 = vld [vmem:[#allocation18_spill] sm:$0xff] }
 0x1c1   :  { %613 = vmatmul.mubr.msk.f32.vlgmr.msra.gmra.mrb[0].mxu1 %vm345_vm10, %v343_v7 }
 0x294   :  { %v415_v46 = vpop.f32.mrb[0].mxu1 }
 0x295   :  { %v579_v62 = vmul.f32 -1.442695, %v415_v46  ;;  %v614_v16 = vpop.f32.mrb[1].mxu1 }
 0x297   :  { %638 = vpow2.f32 %v579_v62 }
 0x2a1   :  { %v639_v22 = vpop.eup %638 }
 0x2a2   :  { %v422_v63 = vadd.f32 1.0, %v639_v22 }
 0x2a4   :  { %640 = vrcp.f32 %v422_v63 }
 0x2ae   :  { %v641_v41 = vpop.eup %640 }
 0x2af   :  { %v428_v51 = vrot.slane %v641_v41, %v427_v28  ;;  %v463_v48 = vrot.slane %v641_v41, %v462_v52 }
 0x2b1   :  { %434 = vbcast.lane.b32.xlu1 %v428_v51, 264  ;;  %430 = vbcast.lane.b32.xlu0 %v428_v51, 256 }
 0x2b5   :  { %438 = vbcast.lane.b32.xlu1 %v428_v51, 272  ;;  %446 = vbcast.lane.b32.xlu0 %v428_v51, 288 }
 0x2b9   :  { %442 = vbcast.lane.b32.xlu1 %v428_v51, 280  ;;  %454 = vbcast.lane.b32.xlu0 %v428_v51, 304 }
 0x2bd   :  { %450 = vbcast.lane.b32.xlu1 %v428_v51, 296  ;;  %465 = vbcast.lane.b32.xlu0 %v463_v48, 256 }
 0x2c1   :  { %458 = vbcast.lane.b32.xlu1 %v428_v51, 312  ;;  %473 = vbcast.lane.b32.xlu0 %v463_v48, 272 }
 0x2c5   :  { %469 = vbcast.lane.b32.xlu1 %v463_v48, 264  ;;  %481 = vbcast.lane.b32.xlu0 %v463_v48, 288 }
 0x2c9   :  { %477 = vbcast.lane.b32.xlu1 %v463_v48, 280  ;;  %489 = vbcast.lane.b32.xlu0 %v463_v48, 304 }
 0x2cd   :  { %485 = vbcast.lane.b32.xlu1 %v463_v48, 296 }
 0x2d1   :  { %493 = vbcast.lane.b32.xlu1 %v463_v48, 312 }
 0x323   :  { %v435_v17 = vpop.permute.xlu1 %434  ;;  %v431_v49 = vpop.permute.xlu0 %430 }
 0x324   :  { %v497_v55 = vmul.f32 %v435_v17, %v822_v8  ;;  %v498_v56 = vmul.f32 %v435_v17, %v824_v9  ;;  %v495_v23 = vmul.f32 %v431_v49, %v810_v2  ;;  %v496_v58 = vmul.f32 %v431_v49, %v814_v4 }
 0x326   :  { %529 = vst [vmem:[#allocation8 + $0x10] sm:$0xff] %v497_v55  ;;  %530 = vst [vmem:[#allocation8 + $0x18] sm:$0xff] %v498_v56 }
 0x327   :  { %527 = vst [vmem:[#allocation8] sm:$0xff] %v495_v23  ;;  %528 = vst [vmem:[#allocation8 + $0x8] sm:$0xff] %v496_v58  ;;  %v439_v50 = vpop.permute.xlu1 %438  ;;  %v447_v59 = vpop.permute.xlu0 %446 }
 0x328   :  { %v499_v47 = vmul.f32 %v439_v50, %v834_v14  ;;  %v500_v53 = vmul.f32 %v439_v50, %v836_v15  ;;  %v503_v43 = vmul.f32 %v447_v59, %v858_v26  ;;  %v504_v8 = vmul.f32 %v447_v59, %v860_v27 }
 0x32a   :  { %531 = vst [vmem:[#allocation8 + $0x20] sm:$0xff] %v499_v47  ;;  %532 = vst [vmem:[#allocation8 + $0x28] sm:$0xff] %v500_v53 }
 0x32b   :  { %535 = vst [vmem:[#allocation8 + $0x40] sm:$0xff] %v503_v43  ;;  %536 = vst [vmem:[#allocation8 + $0x48] sm:$0xff] %v504_v8  ;;  %v443_v2 = vpop.permute.xlu1 %442  ;;  %v455_v4 = vpop.permute.xlu0 %454 }
 0x32c   :  { %v501_v9 = vmul.f32 %v443_v2, %v846_v20  ;;  %v502_v36 = vmul.f32 %v443_v2, %v848_v21  ;;  %v507_v37 = vmul.f32 %v455_v4, %v882_v38  ;;  %v508_v14 = vmul.f32 %v455_v4, %v884_v39 }
 0x32e   :  { %533 = vst [vmem:[#allocation8 + $0x30] sm:$0xff] %v501_v9  ;;  %534 = vst [vmem:[#allocation8 + $0x38] sm:$0xff] %v502_v36 }
 0x32f   :  { %539 = vst [vmem:[#allocation8 + $0x60] sm:$0xff] %v507_v37  ;;  %540 = vst [vmem:[#allocation8 + $0x68] sm:$0xff] %v508_v14  ;;  %v451_v15 = vpop.permute.xlu1 %450  ;;  %v466_v26 = vpop.permute.xlu0 %465 }
 0x330   :  { %v505_v27 = vmul.f32 %v451_v15, %v870_v32  ;;  %v506_v31 = vmul.f32 %v451_v15, %v872_v33  ;;  %v511_v42 = vmul.f32 %v466_v26, %v806_v0  ;;  %v512_v20 = vmul.f32 %v466_v26, %v808_v1 }
 0x332   :  { %537 = vst [vmem:[#allocation8 + $0x50] sm:$0xff] %v505_v27  ;;  %538 = vst [vmem:[#allocation8 + $0x58] sm:$0xff] %v506_v31 }
 0x333   :  { %543 = vst [vmem:[#allocation8 + $0x80] sm:$0xff] %v511_v42  ;;  %544 = vst [vmem:[#allocation8 + $0x88] sm:$0xff] %v512_v20  ;;  %v459_v21 = vpop.permute.xlu1 %458  ;;  %v474_v38 = vpop.permute.xlu0 %473 }
 0x334   :  { %v509_v39 = vmul.f32 %v459_v21, %v894_v44  ;;  %v510_v19 = vmul.f32 %v459_v21, %v896_v45  ;;  %v515_v54 = vmul.f32 %v474_v38, %v830_v12  ;;  %v516_v32 = vmul.f32 %v474_v38, %v832_v13 }
 0x336   :  { %541 = vst [vmem:[#allocation8 + $0x70] sm:$0xff] %v509_v39  ;;  %542 = vst [vmem:[#allocation8 + $0x78] sm:$0xff] %v510_v19 }
 0x337   :  { %547 = vst [vmem:[#allocation8 + $0xa0] sm:$0xff] %v515_v54  ;;  %548 = vst [vmem:[#allocation8 + $0xa8] sm:$0xff] %v516_v32  ;;  %v470_v0 = vpop.permute.xlu1 %469  ;;  %v482_v1 = vpop.permute.xlu0 %481 }
 0x338   :  { %v513_v33 = vmul.f32 %v470_v0, %v816_v5  ;;  %v514_v30 = vmul.f32 %v470_v0, %v818_v6  ;;  %v519_v57 = vmul.f32 %v482_v1, %v854_v24  ;;  %v520_v44 = vmul.f32 %v482_v1, %v856_v25  ;;  %v994_v24 = vld [vmem:[#allocation13_spill] sm:$0xff] }
 0x33a   :  { %545 = vst [vmem:[#allocation8 + $0x90] sm:$0xff] %v513_v33  ;;  %546 = vst [vmem:[#allocation8 + $0x98] sm:$0xff] %v514_v30 }
 0x33b   :  { %551 = vst [vmem:[#allocation8 + $0xc0] sm:$0xff] %v519_v57  ;;  %552 = vst [vmem:[#allocation8 + $0xc8] sm:$0xff] %v520_v44  ;;  %v478_v12 = vpop.permute.xlu1 %477  ;;  %v490_v13 = vpop.permute.xlu0 %489 }
 0x33c   :  { %v517_v45 = vmul.f32 %v478_v12, %v842_v18  ;;  %v518_v61 = vmul.f32 %v478_v12, %v991_v60  ;;  %v523_v29 = vmul.f32 %v490_v13, %v992_v10  ;;  %v524_v5 = vmul.f32 %v490_v13, %v993_v34 }
 0x33e   :  { %549 = vst [vmem:[#allocation8 + $0xb0] sm:$0xff] %v517_v45  ;;  %550 = vst [vmem:[#allocation8 + $0xb8] sm:$0xff] %v518_v61 }
 0x33f   :  { %555 = vst [vmem:[#allocation8 + $0xe0] sm:$0xff] %v523_v29  ;;  %556 = vst [vmem:[#allocation8 + $0xe8] sm:$0xff] %v524_v5  ;;  %v486_v6 = vpop.permute.xlu1 %485 }
 0x340   :  { %v521_v25 = vmul.f32 %v486_v6, %v994_v24  ;;  %v522_v35 = vmul.f32 %v486_v6, %v995_v3 }
 0x342   :  { %553 = vst [vmem:[#allocation8 + $0xd0] sm:$0xff] %v521_v25  ;;  %554 = vst [vmem:[#allocation8 + $0xd8] sm:$0xff] %v522_v35 }
 0x343   :  { %v494_v18 = vpop.permute.xlu1 %493 }
 0x344   :  { %v525_v7 = vmul.f32 %v494_v18, %v996_v40  ;;  %v526_v46 = vmul.f32 %v494_v18, %v997_v11 }
 0x346   :  { %557 = vst [vmem:[#allocation8 + $0xf0] sm:$0xff] %v525_v7  ;;  %558 = vst [vmem:[#allocation8 + $0xf8] sm:$0xff] %v526_v46 }
 0x347   :  { %719 = shalt.err (!%p716_p0)
}
 0x348   :  { %s720_s27 = scalar_lea.hbm %s976_s3, 4096 }
 0x349   :  { %p721_p1 = scmp.ne.s32.totalorder %s976_s3, %s720_s27  ;;  %p724_p2 = scmp.lt.u32.totalorder %s720_s27, %s976_s3 }
 0x34b   :  { %p726_p3 = pnand %p724_p2, %p721_p1 }
 0x34d   :  { %729 = shalt.err (!%p726_p3)
}
 0x34e   :  { %570 = dma.vmem_to_hbm [thread:$0]  %s565_s23, 4096, %s976_s3, [#allocation4], %s740_s1, %s740_s1, %s741_s9  }
 0x34f   :  { %734 = dma.done.wait [#allocation4], 4096  }
 0x350   :  { %735 = vsyncadd [#allocation4], 4294963200 }
 0x351   :  { %574 = vsyncpa [#allocation3], 1 }
 0x352   :  { %575 = vsyncpa [#allocation6], 1 }
 0x353   :  { %576 = vsyncpa [#allocation4], 1 }

</bundles_post_ra>
